<compile_context>
chip_gen: v7x
topology: tpu7x:2x2x1
jax: 0.10.0
libtpu: 0.0.40
codegen_flags: <defaults>
</compile_context>

<pallas_src>
import math

import jax
import jax.numpy as jnp
from jax.experimental import pallas as pl
from jax.experimental.pallas import tpu as pltpu


# --------------------------------------------------------------------------- #
# Hardware / tiling helpers
# --------------------------------------------------------------------------- #
def _vmem_limit_bytes():
    """Per-generation scoped-VMEM limit."""
    kind = ""
    try:
        kind = jax.devices()[0].device_kind.lower()
    except Exception:
        pass
    if "v7" in kind or "7x" in kind:
        return 48 * 1024 * 1024          # v7x: 64 MiB physical VMEM per TC
    if "v5" in kind or "v6" in kind:
        return 96 * 1024 * 1024          # v5e/v5p/v6e: 128 MiB physical VMEM
    return 32 * 1024 * 1024              # conservative default (older gens)


def _tile_candidates(seq_len, cap):
    """Tile sizes (largest first) that divide seq_len; prefer 128-multiples."""
    cands = [t for t in (512, 384, 256, 128, 64, 32, 16, 8)
             if t <= cap and t <= seq_len and seq_len % t == 0]
    if seq_len <= cap and seq_len not in cands:
        cands.insert(0, seq_len)         # full-length block ((8,128)-rule escape hatch)
    if not cands:
        cands = [seq_len]
    return cands


def _attn_vmem_bytes(tq, tk, D_in, d_k, itemsize):
    """Approx. VMEM footprint of the attention kernel (double-buffered streams)."""
    streamed = 2 * (tq * D_in + 2 * tk * d_k + tq * d_k) * itemsize   # x1, K, V, out
    weights = 2 * (D_in * d_k + d_k) * itemsize                       # Wq, bq (2x buffered)
    scratch = tq * d_k * itemsize + tq * d_k * 4 + 2 * tq * 4         # q_sc, acc, m, l
    return streamed + weights + scratch


def _pick_attention_tiles(S1, S2, D_in, d_k, itemsize, budget):
    for tq in _tile_candidates(S1, 512):
        for tk in _tile_candidates(S2, 512):
            if _attn_vmem_bytes(tq, tk, D_in, d_k, itemsize) <= budget:
                return tq, tk
    return _tile_candidates(S1, 8)[-1], _tile_candidates(S2, 8)[-1]


def _pick_proj_tile(S2, D_in, d_k, itemsize, budget):
    for tkp in _tile_candidates(S2, 512):
        use = (2 * (tkp * D_in + 2 * tkp * d_k) * itemsize       # x2 + K + V streams
               + 2 * (2 * D_in * d_k + d_k) * itemsize)          # Wk, Wv, bv
        if use <= budget:
            return tkp
    return _tile_candidates(S2, 8)[-1]


# --------------------------------------------------------------------------- #
# Stage 1: K / V projection (computed once over x2)
# --------------------------------------------------------------------------- #
def _kv_proj_kernel(x2_ref, wk_ref, wv_ref, bv_ref, k_ref, v_ref):
    # K = x2 @ Wk  — the key bias bk is dropped on purpose: q·bk is constant
    # across keys for a given query row, so softmax(QK^T) is unaffected.
    x2 = x2_ref[0]                                                    # (tkp, D_in)
    k_ref[0] = jnp.dot(x2, wk_ref[...],
                       preferred_element_type=jnp.float32).astype(k_ref.dtype)
    v_ref[0] = (jnp.dot(x2, wv_ref[...], preferred_element_type=jnp.float32)
                + bv_ref[...]).astype(v_ref.dtype)


def _project_kv(x2, wk, wv, bv, *, vmem_limit):
    B, S2, D_in = x2.shape
    d_k = wk.shape[1]
    itemsize = jnp.dtype(x2.dtype).itemsize
    tkp = _pick_proj_tile(S2, D_in, d_k, itemsize, int(vmem_limit * 0.85))
    assert S2 % tkp == 0

    x2_spec = pl.BlockSpec((1, tkp, D_in), lambda b, j: (b, j, 0))
    w_spec = pl.BlockSpec((D_in, d_k), lambda b, j: (0, 0))
    b_spec = pl.BlockSpec((1, d_k), lambda b, j: (0, 0))
    kv_spec = pl.BlockSpec((1, tkp, d_k), lambda b, j: (b, j, 0))

    return pl.pallas_call(
        _kv_proj_kernel,
        out_shape=(jax.ShapeDtypeStruct((B, S2, d_k), x2.dtype),
                   jax.ShapeDtypeStruct((B, S2, d_k), x2.dtype)),
        grid_spec=pltpu.PrefetchScalarGridSpec(
            num_scalar_prefetch=0,
            grid=(B, S2 // tkp),
            in_specs=[x2_spec, w_spec, w_spec, b_spec],
            out_specs=[kv_spec, kv_spec],
        ),
        compiler_params=pltpu.CompilerParams(
            dimension_semantics=("parallel", "parallel"),
            vmem_limit_bytes=vmem_limit,
        ),
    )(x2, wk, wv, bv)


# --------------------------------------------------------------------------- #
# Stage 2: flash attention (Q projected in-kernel, online softmax over KV)
# --------------------------------------------------------------------------- #
def _flash_attn_kernel(x1_ref, k_ref, v_ref, wq_ref, bq_ref, o_ref,
                       q_sc, m_sc, l_sc, acc_sc):
    kv = pl.program_id(2)

    # ---- once per query tile: project Q, fold in 1/sqrt(d_k), init stats ----
    @pl.when(kv == 0)
    def _():
        d_k = q_sc.shape[-1]
        scale = 1.0 / math.sqrt(float(d_k))
        q = (jnp.dot(x1_ref[0], wq_ref[...],
                     preferred_element_type=jnp.float32)
             + bq_ref[...]) * scale                                   # (tq, d_k)
        q_sc[...] = q.astype(q_sc.dtype)          # compute dtype feeds the MXU
        m_sc[...] = jnp.full_like(m_sc, -jnp.inf)
        l_sc[...] = jnp.zeros_like(l_sc)
        acc_sc[...] = jnp.zeros_like(acc_sc)

    k = k_ref[0]                                                      # (tk, d_k)
    v = v_ref[0]                                                      # (tk, d_k)

    # Scores: contract the last dims of Q and K directly (q @ k^T with no
    # materialized transpose). Scale already folded into Q.
    s = jax.lax.dot_general(
        q_sc[...], k, dimension_numbers=(((1,), (1,)), ((), ())),
        preferred_element_type=jnp.float32)                           # (tq, tk)

    # ---- online softmax update (stats / accumulator in f32) -----------------
    m_prev = m_sc[...]
    m_new = jnp.maximum(m_prev, jnp.max(s, axis=-1, keepdims=True))
    alpha = jnp.exp(m_prev - m_new)                                   # (tq, 1)
    p = jnp.exp(s - m_new)                                            # (tq, tk)
    l_sc[...] = alpha * l_sc[...] + jnp.sum(p, axis=-1, keepdims=True)
    acc_sc[...] = alpha * acc_sc[...] + jnp.dot(
        p.astype(v.dtype), v, preferred_element_type=jnp.float32)     # (tq, d_k)
    m_sc[...] = m_new

    # ---- finalize on the last KV step ----------------------------------------
    @pl.when(kv == pl.num_programs(2) - 1)
    def _():
        inv_l = pl.reciprocal(l_sc[...], approx=True)                 # EUP slot
        o_ref[0] = (acc_sc[...] * inv_l).astype(o_ref.dtype)


def cross_attention(x1, x2, wq, bq, wk, bk, wv, bv,
                    *, block_q=None, block_k=None):
    """x1: (B, S1, D_in); x2: (B, S2, D_in); w*: (D_in, d_k); b*: (1, d_k).

    `bk` is accepted for nn.Linear parity but unused: softmax is invariant to
    the key bias, so the attention output is mathematically identical.
    """
    del bk
    B, S1, D_in = x1.shape
    B2, S2, D_in2 = x2.shape
    assert B == B2 and D_in == D_in2
    d_k = wq.shape[1]
    compute_dtype = x1.dtype
    itemsize = jnp.dtype(compute_dtype).itemsize

    vmem_limit = _vmem_limit_bytes()

    # Stage 1: project K/V once (not per query tile).
    k, v = _project_kv(x2, wk, wv, bv, vmem_limit=vmem_limit)

    # Stage 2: flash attention, streaming (tk, d_k) K/V tiles.
    budget = int(vmem_limit * 0.85)
    tq_auto, tk_auto = _pick_attention_tiles(S1, S2, D_in, d_k, itemsize, budget)
    tq = block_q if block_q is not None else tq_auto
    tk = block_k if block_k is not None else tk_auto
    assert S1 % tq == 0 and S2 % tk == 0, "sequence lengths must be tileable"
    # TODO(synk): non-divisible S1/S2 would need a key-length mask applied
    # before the online-softmax max/exp; not implemented here.

    grid = (B, S1 // tq, S2 // tk)

    x1_spec = pl.BlockSpec((1, tq, D_in), lambda b, i, j: (b, i, 0))
    k_spec = pl.BlockSpec((1, tk, d_k), lambda b, i, j: (b, j, 0))
    v_spec = pl.BlockSpec((1, tk, d_k), lambda b, i, j: (b, j, 0))
    wq_spec = pl.BlockSpec((D_in, d_k), lambda b, i, j: (0, 0))
    bq_spec = pl.BlockSpec((1, d_k), lambda b, i, j: (0, 0))
    o_spec = pl.BlockSpec((1, tq, d_k), lambda b, i, j: (b, i, 0))

    return pl.pallas_call(
        _flash_attn_kernel,
        out_shape=jax.ShapeDtypeStruct((B, S1, d_k), compute_dtype),
        grid_spec=pltpu.PrefetchScalarGridSpec(
            num_scalar_prefetch=0,
            grid=grid,
            in_specs=[x1_spec, k_spec, v_spec, wq_spec, bq_spec],
            out_specs=o_spec,
            scratch_shapes=[
                pltpu.VMEM((tq, d_k), compute_dtype),  # Q tile (MXU-feed dtype)
                pltpu.VMEM((tq, 1), jnp.float32),      # running max m
                pltpu.VMEM((tq, 1), jnp.float32),      # running sum l
                pltpu.VMEM((tq, d_k), jnp.float32),    # output accumulator
            ],
        ),
        compiler_params=pltpu.CompilerParams(
            dimension_semantics=("parallel", "parallel", "arbitrary"),
            vmem_limit_bytes=vmem_limit,
        ),
    )(x1, k, v, wq, bq)


# --------------------------------------------------------------------------- #
# Reference (exact PyTorch module semantics, including bk)
# --------------------------------------------------------------------------- #
def _reference(x1, x2, wq, bq, wk, bk, wv, bv):
    q = x1 @ wq + bq
    k = x2 @ wk + bk
    v = x2 @ wv + bv
    scores = jnp.einsum("bqd,bkd->bqk", q, k) / jnp.sqrt(jnp.float32(q.shape[-1]))
    attn = jax.nn.softmax(scores, axis=-1)
    return jnp.einsum("bqk,bkd->bqd", attn, v)


if __name__ == "__main__":
    # Small shapes; distinct S1 / S2 to exercise true cross-attention.
    B, S1, S2, D_in, d_k = 2, 16, 24, 32, 16

    key = jax.random.PRNGKey(0)
    k1, k2, kq, kbq, kk, kbk, kv, kbv = jax.random.split(key, 8)

    x1 = jax.random.normal(k1, (B, S1, D_in), dtype=jnp.float32)
    x2 = jax.random.normal(k2, (B, S2, D_in), dtype=jnp.float32)

    # nn.Linear-style init (weights stored transposed as (D_in, d_k)).
    bound = 1.0 / jnp.sqrt(jnp.float32(D_in))
    wq = jax.random.uniform(kq, (D_in, d_k), jnp.float32, -bound, bound)
    bq = jax.random.uniform(kbq, (1, d_k), jnp.float32, -bound, bound)
    wk = jax.random.uniform(kk, (D_in, d_k), jnp.float32, -bound, bound)
    bk = jax.random.uniform(kbk, (1, d_k), jnp.float32, -bound, bound)
    wv = jax.random.uniform(kv, (D_in, d_k), jnp.float32, -bound, bound)
    bv = jax.random.uniform(kbv, (1, d_k), jnp.float32, -bound, bound)

    ref = _reference(x1, x2, wq, bq, wk, bk, wv, bv)

    # 1) auto-tiled path (VMEM-budget-aware tile selection).
    out_auto = cross_attention(x1, x2, wq, bq, wk, bk, wv, bv)
    out_auto = jax.block_until_ready(out_auto)

    # 2) forced-small-block path: exercises the multi-KV-step online softmax.
    out_small = cross_attention(x1, x2, wq, bq, wk, bk, wv, bv,
                                block_q=8, block_k=8)
    out_small = jax.block_until_ready(out_small)

    assert out_auto.shape == (B, S1, d_k)
    # Tolerance accounts for the approximate (EUP) reciprocal in the softmax
    # and the (mathematically exact) dropped key-bias.
    assert jnp.allclose(out_auto, ref, atol=2e-3, rtol=2e-3), (
        float(jnp.max(jnp.abs(out_auto - ref))))
    assert jnp.allclose(out_small, ref, atol=2e-3, rtol=2e-3), (
        float(jnp.max(jnp.abs(out_small - ref))))

    print("KERNEL_OK")
</pallas_src>

<mosaic_0001>
module attributes {stable_mosaic.version = 11 : i64} {
  func.func @_kv_proj_kernel(%arg0: i32, %arg1: i32, %arg2: memref<1x24x32xf32, #tpu.memory_space<vmem>>, %arg3: memref<32x16xf32, #tpu.memory_space<vmem>>, %arg4: memref<32x16xf32, #tpu.memory_space<vmem>>, %arg5: memref<1x16xf32, #tpu.memory_space<vmem>>, %arg6: memref<1x24x16xf32, #tpu.memory_space<vmem>>, %arg7: memref<1x24x16xf32, #tpu.memory_space<vmem>>) attributes {dimension_semantics = [#tpu.dimension_semantics<parallel>, #tpu.dimension_semantics<parallel>], iteration_bounds = array<i64: 2, 1>, scalar_prefetch = 0 : i64, scratch_operands = 0 : i64, tpu.core_type = #tpu.core_type<tc>, window_params = [{transform_indices = @transform_0, window_bounds = array<i64: 1, 24, 32>}, {pipeline_mode = #tpu.pipeline_mode<synchronous>, transform_indices = @transform_1, window_bounds = array<i64: 32, 16>}, {pipeline_mode = #tpu.pipeline_mode<synchronous>, transform_indices = @transform_2, window_bounds = array<i64: 32, 16>}, {pipeline_mode = #tpu.pipeline_mode<synchronous>, transform_indices = @transform_3, window_bounds = array<i64: 1, 16>}, {transform_indices = @transform_4, window_bounds = array<i64: 1, 24, 16>}, {transform_indices = @transform_5, window_bounds = array<i64: 1, 24, 16>}]} {
    %c0 = arith.constant 0 : index
    %c0_0 = arith.constant 0 : index
    %c0_1 = arith.constant 0 : index
    %0 = vector.load %arg2[%c0, %c0_0, %c0_1] : memref<1x24x32xf32, #tpu.memory_space<vmem>>, vector<1x24x32xf32>
    %1 = vector.shape_cast %0 : vector<1x24x32xf32> to vector<24x32xf32>
    %c0_2 = arith.constant 0 : index
    %c0_3 = arith.constant 0 : index
    %2 = vector.load %arg3[%c0_2, %c0_3] : memref<32x16xf32, #tpu.memory_space<vmem>>, vector<32x16xf32>
    %cst = arith.constant dense<0.000000e+00> : vector<24x16xf32>
    %3 = tpu.matmul %1, %2, %cst {dimension_numbers = #tpu.dot_dimension_numbers<[1], [0], [0], [1], [0, 0, 1, 1], [], []>} : vector<24x32xf32>, vector<32x16xf32>, vector<24x16xf32> -> vector<24x16xf32>
    %c0_4 = arith.constant 0 : index
    %c0_5 = arith.constant 0 : index
    %c0_6 = arith.constant 0 : index
    %4 = vector.load %arg6[%c0_4, %c0_5, %c0_6] : memref<1x24x16xf32, #tpu.memory_space<vmem>>, vector<1x24x16xf32>
    %5 = vector.shape_cast %4 : vector<1x24x16xf32> to vector<24x16xf32>
    %6 = vector.shape_cast %3 : vector<24x16xf32> to vector<1x24x16xf32>
    tpu.vector_store %arg6[%c0_4, %c0_5, %c0_6], %6 {strides = array<i32>} : memref<1x24x16xf32, #tpu.memory_space<vmem>>, vector<1x24x16xf32>,
    %c0_7 = arith.constant 0 : index
    %c0_8 = arith.constant 0 : index
    %7 = vector.load %arg4[%c0_7, %c0_8] : memref<32x16xf32, #tpu.memory_space<vmem>>, vector<32x16xf32>
    %cst_9 = arith.constant dense<0.000000e+00> : vector<24x16xf32>
    %8 = tpu.matmul %1, %7, %cst_9 {dimension_numbers = #tpu.dot_dimension_numbers<[1], [0], [0], [1], [0, 0, 1, 1], [], []>} : vector<24x32xf32>, vector<32x16xf32>, vector<24x16xf32> -> vector<24x16xf32>
    %c0_10 = arith.constant 0 : index
    %c0_11 = arith.constant 0 : index
    %9 = vector.load %arg5[%c0_10, %c0_11] : memref<1x16xf32, #tpu.memory_space<vmem>>, vector<1x16xf32>
    %10 = vector.broadcast %9 : vector<1x16xf32> to vector<24x16xf32>
    %11 = arith.addf %8, %10 : vector<24x16xf32>
    %c0_12 = arith.constant 0 : index
    %c0_13 = arith.constant 0 : index
    %c0_14 = arith.constant 0 : index
    %12 = vector.load %arg7[%c0_12, %c0_13, %c0_14] : memref<1x24x16xf32, #tpu.memory_space<vmem>>, vector<1x24x16xf32>
    %13 = vector.shape_cast %12 : vector<1x24x16xf32> to vector<24x16xf32>
    %14 = vector.shape_cast %11 : vector<24x16xf32> to vector<1x24x16xf32>
    tpu.vector_store %arg7[%c0_12, %c0_13, %c0_14], %14 {strides = array<i32>} : memref<1x24x16xf32, #tpu.memory_space<vmem>>, vector<1x24x16xf32>,
    return
  }
  func.func @transform_0(%arg0: i32, %arg1: i32) -> (i32, i32, i32) {
    %c0_i32 = arith.constant 0 : i32
    %c0_i32_0 = arith.constant 0 : i32
    return %arg0, %arg1, %c0_i32 : i32, i32, i32
  }
  func.func @transform_1(%arg0: i32, %arg1: i32) -> (i32, i32) {
    %c0_i32 = arith.constant 0 : i32
    %c0_i32_0 = arith.constant 0 : i32
    %c0_i32_1 = arith.constant 0 : i32
    return %c0_i32, %c0_i32_0 : i32, i32
  }
  func.func @transform_2(%arg0: i32, %arg1: i32) -> (i32, i32) {
    %c0_i32 = arith.constant 0 : i32
    %c0_i32_0 = arith.constant 0 : i32
    %c0_i32_1 = arith.constant 0 : i32
    return %c0_i32, %c0_i32_0 : i32, i32
  }
  func.func @transform_3(%arg0: i32, %arg1: i32) -> (i32, i32) {
    %c0_i32 = arith.constant 0 : i32
    %c0_i32_0 = arith.constant 0 : i32
    %c0_i32_1 = arith.constant 0 : i32
    return %c0_i32, %c0_i32_0 : i32, i32
  }
  func.func @transform_4(%arg0: i32, %arg1: i32) -> (i32, i32, i32) {
    %c0_i32 = arith.constant 0 : i32
    %c0_i32_0 = arith.constant 0 : i32
    return %arg0, %arg1, %c0_i32 : i32, i32, i32
  }
  func.func @transform_5(%arg0: i32, %arg1: i32) -> (i32, i32, i32) {
    %c0_i32 = arith.constant 0 : i32
    %c0_i32_0 = arith.constant 0 : i32
    return %arg0, %arg1, %c0_i32 : i32, i32, i32
  }
}

</mosaic_0001>

<bundles_post_ra>
// kernel: tpu_custom_call.1
= control target key start
LH: loop header
LB: loop body
LE: loop exit
PB: predicated region body
PF: predicated region fallthrough
CT: control target
= control target key end

     0   :  { %s782_s18 = smov 0   ;;  %s784_s19 = smov 0   ;;  %s861_s0 = inlined_call_operand.vmem [shape: f32[2,24,32], index: 0, kind: input, shape index: {}]   ;;  %s862_s1 = inlined_call_operand.vmem [shape: f32[32,16], index: 1, kind: input, shape index: {}]   ;;  %s863_s2 = inlined_call_operand.vmem [shape: f32[32,16], index: 2, kind: input, shape index: {}]   ;;  %s864_s3 = inlined_call_operand.vmem [shape: f32[1,16], index: 3, kind: input, shape index: {}]   ;;  %s865_s4 = inlined_call_operand.vmem [shape: f32[2,24,16], index: 4, kind: output, shape index: {0}]   ;;  %s866_s5 = inlined_call_operand.vmem [shape: f32[2,24,16], index: 5, kind: output, shape index: {1}]  }
   0x1   :  { %s786_s20 = smov 0  }
   0x2 LB: > { %s28_s21 = sadd.s32 1, %s743_s19  ;;  %p624_p0 = scmp.ge.s32.totalorder %s747_s20, 1  ;;  %s747_s20 = sphi %s786_s20, %s16_s20   ;;  %s743_s19 = sphi %s784_s19, %s868_s19   ;;  %s739_s18 = sphi %s782_s18, %s867_s18  }
   0x3   : > { %p30_p1 = scmp.ge.s32.totalorder %s28_s21, 2  ;;  %p213_p2 = scmp.lt.s32.totalorder %s747_s20, 3 }
   0x5   : > { %s870_s21 = smov (%p30_p1, %s28_s21), 0  ;;  %p214_p3 = pnand %p624_p0, %p213_p2 }
   0x6   : > { %v389_v0 = vld [vmem:[%s863_s2] sm:$0xff] (!%p214_p3)  ;;  %v390_v1 = vld [vmem:[%s863_s2 + $0x8] sm:$0xff] (!%p214_p3)  ;;  %v749_v3 = vmov (!%p214_p3), 0.0|0.0   ;;  %v391_v6 = vld [vmem:[%s863_s2 + $0x10] sm:$0xff] (!%p214_p3)  ;;  %p259_p4 = scmp.lt.s32.totalorder (!%p214_p3), %s739_s18, 1  ;;  %vm750_vm0 = vmmov (!%p214_p3), 0  }
   0x7   : > { %217 = sbr.rel (%p214_p3) target bundleno = 242 (0xf2), region = 36  ;;  %v291_v2 = vld [vmem:[%s862_s1] sm:$0xff] (!%p214_p3)  ;;  %691 = vmatprep.subr.bf16.mxu1 (!%p214_p3), %v749_v3  ;;  %685 = vmatprep.subr.bf16.mxu0 (!%p214_p3), %v749_v3  ;;  %v692_v4 = vpack.c.bf16 (!%p214_p3), %v390_v1, %v389_v0  ;;  %v292_v5 = vld [vmem:[%s862_s1 + $0x8] sm:$0xff] (!%p214_p3)  ;;  %v392_v7 = vld [vmem:[%s863_s2 + $0x18] sm:$0xff] (!%p214_p3)  ;;  %v751_v11 = vmov (!%p214_p3), 0.0   ;;  %vm295_vm1 = vcmask (!%p214_p3), 261120  }
   0x8   : > { %v686_v8 = vpack.c.bf16 (!%p214_p3), %v292_v5, %v291_v2  ;;  %v293_v9 = vld [vmem:[%s862_s1 + $0x10] sm:$0xff] (!%p214_p3)  ;;  %v294_v10 = vld [vmem:[%s862_s1 + $0x18] sm:$0xff] (!%p214_p3)  ;;  %676 = vmatprep.mubr.msk.f32.mxu1 (!%p214_p3), %vm750_vm0, %v751_v11  ;;  %659 = vmatprep.mubr.msk.f32.mxu0 (!%p214_p3), %vm750_vm0, %v751_v11  ;;  %v695_v12 = vpack.c.bf16 (!%p214_p3), %v392_v7, %v391_v6  ;;  %v631_v17 = vld [vmem:[%s864_s3] ss:$0 sm:$0xff] (!%p214_p3)  ;;  %vm385_vm2 = vcmask (!%p214_p3), 130048  }
   0x9   : > { %693 = vmatpush3.bf16.msra.mxu1 (!%p214_p3), %v692_v4  ;;  %v689_v13 = vpack.c.bf16 (!%p214_p3), %v294_v10, %v293_v9 }
   0xa   : > { %687 = vmatpush3.bf16.msra.mxu0 (!%p214_p3), %v686_v8  ;;  %694 = vmatprep.subr.bf16.mxu1 (!%p214_p3), %v749_v3 }
   0xb   : > { %688 = vmatprep.subr.bf16.mxu0 (!%p214_p3), %v749_v3 }
   0xd   : > { %696 = vmatpush3.bf16.msra.mxu1 (!%p214_p3), %v695_v12 }
   0xe   : > { %s872_s18 = smov (!%p259_p4, %s739_s18), 1  ;;  %690 = vmatpush3.bf16.msra.mxu0 %v689_v13 }
   0xf   : > { %s697_s13 = smul.u32 24, %s872_s18 }
  0x11   : > { %s266_s16 = scalar_lea.vmem %s861_s0, %s697_s13  ;;  %s276_s24 = scalar_lea.vmem %s865_s4, %s697_s13 }
  0x12   : > { %v288_v14 = vld [vmem:[%s266_s16] sm:$0xff]  ;;  %v289_v15 = vld [vmem:[%s266_s16 + $0x8] sm:$0xff]  ;;  %v290_v16 = vld [vmem:[%s266_s16 + $0x10] sm:$0xff]  ;;  %s286_s27 = scalar_lea.vmem %s866_s5, %s697_s13 }
  0x13   : > { %677 = vmatmul.mubr.msk.f32.vlgmr.msra.gmra.mrb[0].mxu1 %vm295_vm1, %v288_v14  ;;  %660 = vmatmul.mubr.msk.f32.vlgmr.msra.gmra.mrb[0].mxu0 %vm295_vm1, %v288_v14 }
  0x14   : > { %679 = vmatprep.mubr.msk.f32.mxu1 %vm750_vm0, %v751_v11  ;;  %662 = vmatprep.mubr.msk.f32.mxu0 %vm750_vm0, %v751_v11 }
  0x17   : > { %680 = vmatmul.mubr.msk.f32.gmra.mrb[2].mxu1 %vm295_vm1, %v289_v15  ;;  %663 = vmatmul.mubr.msk.f32.gmra.mrb[2].mxu0 %vm295_vm1, %v289_v15 }
  0x18   : > { %682 = vmatprep.mubr.msk.f32.mxu1 %vm750_vm0, %v751_v11  ;;  %665 = vmatprep.mubr.msk.f32.mxu0 %vm750_vm0, %v751_v11 }
  0x1b   : > { %683 = vmatmul.mubr.msk.f32.gmra.mrb[4].mxu1 %vm295_vm1, %v290_v16  ;;  %666 = vmatmul.mubr.msk.f32.gmra.mrb[4].mxu0 %vm295_vm1, %v290_v16 }
  0xe6   : > { %v466_v18 = vpop.f32.mrb[0].mxu1  ;;  %v371_v20 = vpop.f32.mrb[0].mxu0 }
  0xe7   : > { %v467_v19 = vadd.f32 %v631_v17, %v466_v18  ;;  %v678_v21 = vpop.f32.mrb[1].mxu1  ;;  %386 = vst.msk [vmem:[%s276_s24] sm:$0xff] %vm385_vm2, %v371_v20  ;;  %v661_v22 = vpop.f32.mrb[1].mxu0 }
  0xe9   : > { %480 = vst.msk [vmem:[%s286_s27] sm:$0xff] %vm385_vm2, %v467_v19 }
  0xea   : > { %v471_v23 = vpop.f32.mrb[2].mxu1  ;;  %v376_v25 = vpop.f32.mrb[2].mxu0 }
  0xeb   : > { %v472_v24 = vadd.f32 %v631_v17, %v471_v23  ;;  %v681_v26 = vpop.f32.mrb[3].mxu1  ;;  %387 = vst.msk [vmem:[%s276_s24 + $0x8] sm:$0xff] %vm385_vm2, %v376_v25  ;;  %v664_v27 = vpop.f32.mrb[3].mxu0 }
  0xed   : > { %481 = vst.msk [vmem:[%s286_s27 + $0x8] sm:$0xff] %vm385_vm2, %v472_v24 }
  0xee   : > { %v476_v28 = vpop.f32.mrb[4].mxu1  ;;  %v381_v30 = vpop.f32.mrb[4].mxu0 }
  0xef   : > { %v477_v29 = vadd.f32 %v631_v17, %v476_v28  ;;  %v684_v31 = vpop.f32.mrb[5].mxu1  ;;  %388 = vst.msk [vmem:[%s276_s24 + $0x10] sm:$0xff] %vm385_vm2, %v381_v30  ;;  %v667_v32 = vpop.f32.mrb[5].mxu0 }
  0xf1   : > { %482 = vst.msk [vmem:[%s286_s27 + $0x10] sm:$0xff] %vm385_vm2, %v477_v29 }
  0xf2 PF: > { %s16_s20 = sadd.s32 1, %s747_s20   ;;  %s867_s18 = smov %s743_s19 }
  0xf3   : > { %p13_p5 = scmp.ge.s32.totalorder %s16_s20, 4   ;;  %s868_s19 = smov %s870_s21 }
  0xf5   :  { %15 = sbr.rel (!%p13_p5) target bundleno = 2 (0x2), region = 78 }

</bundles_post_ra>
